<compile_context>
chip_gen: v7x
topology: tpu7x:2x2x1
jax: 0.10.0
libtpu: 0.0.40
codegen_flags: <defaults>
</compile_context>

<pallas_src>
import jax
import jax.numpy as jnp
from jax.experimental import pallas as pl
from jax.experimental.pallas import tpu as pltpu


def _model_kernel(p_ref, o_ref):
    # p_ref : (10,) f32 SMEM, packed = [x00,x01,x10,x11, w00,w01,w10,w11, b0,b1]
    #         where x[k*2+i] == x1[0, k, i] (row-major flatten of x1[0]).
    # o_ref : (1, 2, 2) f32 VMEM
    x00 = p_ref[0]
    x01 = p_ref[1]
    x10 = p_ref[2]
    x11 = p_ref[3]
    w00 = p_ref[4]
    w01 = p_ref[5]
    w10 = p_ref[6]
    w11 = p_ref[7]
    b0 = p_ref[8]
    b1 = p_ref[9]

    # v2[0, i, j] = sum_k x1[0, k, i] * W[j, k] + b[j]; relu fused in.
    # Pure scalar-unit arithmetic on SMEM scalars (no MXU, no vector loads).
    zero = jnp.float32(0.0)
    s00 = jnp.maximum(x00 * w00 + x10 * w01 + b0, zero)   # x2[0,0,0]
    s01 = jnp.maximum(x00 * w10 + x10 * w11 + b1, zero)   # x2[0,0,1]
    s10 = jnp.maximum(x01 * w00 + x11 * w01 + b0, zero)   # x2[0,1,0]
    s11 = jnp.maximum(x01 * w10 + x11 * w11 + b1, zero)   # x2[0,1,1]

    # Splat the four scalars into the (1,2,2) output layout with 3 selects,
    # and rebuild the residual x1[0,i,j] the same way (no VMEM x1 operand).
    shape = o_ref.shape                                      # (1, 2, 2)
    i_idx = jax.lax.broadcasted_iota(jnp.int32, shape, 1)    # output row    i
    j_idx = jax.lax.broadcasted_iota(jnp.int32, shape, 2)    # output column j

    x2 = jnp.where(i_idx == 0,
                   jnp.where(j_idx == 0, s00, s01),
                   jnp.where(j_idx == 0, s10, s11))
    residual = jnp.where(i_idx == 0,
                         jnp.where(j_idx == 0, x00, x01),
                         jnp.where(j_idx == 0, x10, x11))

    # sigmoid (squeeze(dim=1) is a no-op); exact reciprocal keeps 1e-5 accuracy.
    v7 = 1.0 / (1.0 + jnp.exp(-x2))

    # + x1.squeeze()  (v5 == zeros is numerically inert and dropped)
    o_ref[...] = v7 + residual


def model_forward(x1, weight, bias):
    """x1: (1, 2, 2) f32, weight: (2, 2) f32, bias: (2,) f32 -> (1, 2, 2) f32."""
    assert x1.shape[0] == 1, "x1.squeeze() semantics of the module require B == 1"
    # Single packed SMEM operand: 10 f32 scalars (pads to only 64 B of SMEM).
    packed = jnp.concatenate(
        [x1.reshape(-1), weight.reshape(-1), bias.reshape(-1)]
    ).astype(jnp.float32)

    return pl.pallas_call(
        _model_kernel,
        out_shape=jax.ShapeDtypeStruct(x1.shape, x1.dtype),
        in_specs=[pl.BlockSpec(memory_space=pltpu.MemorySpace.SMEM)],
        out_specs=pl.BlockSpec(memory_space=pltpu.MemorySpace.VMEM),
    )(packed)


def _reference(x1, weight, bias):
    """Pure-JAX reference of the PyTorch forward."""
    v1 = jnp.transpose(x1, (0, 2, 1))
    v2 = v1 @ weight.T + bias
    x2 = jnp.maximum(v2, 0.0)
    v5 = jnp.zeros((x1.shape[0],), x1.dtype)
    v7 = jax.nn.sigmoid(x2)                 # squeeze(dim=1) no-op (size 2)
    v4 = jnp.squeeze(x1)
    return v7 + v4 + v5


if __name__ == "__main__":
    key = jax.random.PRNGKey(0)
    kx, kw, kb = jax.random.split(key, 3)

    # Input consistent with the forward: (B, S, D) = (1, 2, 2)
    x1 = jax.random.normal(kx, (1, 2, 2), dtype=jnp.float32)

    # Deterministic nn.Linear(2, 2)-style init: U(-1/sqrt(in), 1/sqrt(in))
    bound = 1.0 / (2.0 ** 0.5)
    weight = jax.random.uniform(kw, (2, 2), jnp.float32, -bound, bound)
    bias = jax.random.uniform(kb, (2,), jnp.float32, -bound, bound)

    out = jax.block_until_ready(model_forward(x1, weight, bias))
    ref = jax.block_until_ready(_reference(x1, weight, bias))

    assert out.shape == (1, 2, 2), out.shape
    assert jnp.allclose(out, ref, atol=1e-5, rtol=1e-5), (out, ref)
    print("KERNEL_OK")
</pallas_src>

<mosaic_0001>
module attributes {stable_mosaic.version = 11 : i64} {
  func.func @_model_kernel(%arg0: memref<10xf32, #tpu.memory_space<smem>>, %arg1: memref<1x2x2xf32, #tpu.memory_space<vmem>>) attributes {dimension_semantics = [], scalar_prefetch = 0 : i64, scratch_operands = 0 : i64, tpu.core_type = #tpu.core_type<tc>} {
    %c0 = arith.constant 0 : index
    %0 = memref.load %arg0[%c0] : memref<10xf32, #tpu.memory_space<smem>>
    %c1 = arith.constant 1 : index
    %1 = memref.load %arg0[%c1] : memref<10xf32, #tpu.memory_space<smem>>
    %c2 = arith.constant 2 : index
    %2 = memref.load %arg0[%c2] : memref<10xf32, #tpu.memory_space<smem>>
    %c3 = arith.constant 3 : index
    %3 = memref.load %arg0[%c3] : memref<10xf32, #tpu.memory_space<smem>>
    %c4 = arith.constant 4 : index
    %4 = memref.load %arg0[%c4] : memref<10xf32, #tpu.memory_space<smem>>
    %c5 = arith.constant 5 : index
    %5 = memref.load %arg0[%c5] : memref<10xf32, #tpu.memory_space<smem>>
    %c6 = arith.constant 6 : index
    %6 = memref.load %arg0[%c6] : memref<10xf32, #tpu.memory_space<smem>>
    %c7 = arith.constant 7 : index
    %7 = memref.load %arg0[%c7] : memref<10xf32, #tpu.memory_space<smem>>
    %c8 = arith.constant 8 : index
    %8 = memref.load %arg0[%c8] : memref<10xf32, #tpu.memory_space<smem>>
    %c9 = arith.constant 9 : index
    %9 = memref.load %arg0[%c9] : memref<10xf32, #tpu.memory_space<smem>>
    %10 = arith.mulf %0, %4 : f32
    %11 = arith.mulf %2, %5 : f32
    %12 = arith.addf %10, %11 : f32
    %13 = arith.addf %12, %8 : f32
    %cst = arith.constant 0.000000e+00 : f32
    %14 = arith.maximumf %13, %cst : f32
    %15 = arith.mulf %0, %6 : f32
    %16 = arith.mulf %2, %7 : f32
    %17 = arith.addf %15, %16 : f32
    %18 = arith.addf %17, %9 : f32
    %cst_0 = arith.constant 0.000000e+00 : f32
    %19 = arith.maximumf %18, %cst_0 : f32
    %20 = arith.mulf %1, %4 : f32
    %21 = arith.mulf %3, %5 : f32
    %22 = arith.addf %20, %21 : f32
    %23 = arith.addf %22, %8 : f32
    %cst_1 = arith.constant 0.000000e+00 : f32
    %24 = arith.maximumf %23, %cst_1 : f32
    %25 = arith.mulf %1, %6 : f32
    %26 = arith.mulf %3, %7 : f32
    %27 = arith.addf %25, %26 : f32
    %28 = arith.addf %27, %9 : f32
    %cst_2 = arith.constant 0.000000e+00 : f32
    %29 = arith.maximumf %28, %cst_2 : f32
    %30 = tpu.iota {dimensions = array<i32: 1>} : vector<1x2x2xi32>
    %31 = tpu.iota {dimensions = array<i32: 2>} : vector<1x2x2xi32>
    %c0_i32 = arith.constant 0 : i32
    %32 = vector.broadcast %c0_i32 : i32 to vector<1x2x2xi32>
    %33 = arith.cmpi eq, %30, %32 : vector<1x2x2xi32>
    %c0_i32_3 = arith.constant 0 : i32
    %34 = vector.broadcast %c0_i32_3 : i32 to vector<1x2x2xi32>
    %35 = arith.cmpi eq, %31, %34 : vector<1x2x2xi32>
    %36 = vector.broadcast %14 : f32 to vector<1x2x2xf32>
    %37 = vector.broadcast %19 : f32 to vector<1x2x2xf32>
    %38 = arith.select %35, %36, %37 : vector<1x2x2xi1>, vector<1x2x2xf32>
    %c0_i32_4 = arith.constant 0 : i32
    %39 = vector.broadcast %c0_i32_4 : i32 to vector<1x2x2xi32>
    %40 = arith.cmpi eq, %31, %39 : vector<1x2x2xi32>
    %41 = vector.broadcast %24 : f32 to vector<1x2x2xf32>
    %42 = vector.broadcast %29 : f32 to vector<1x2x2xf32>
    %43 = arith.select %40, %41, %42 : vector<1x2x2xi1>, vector<1x2x2xf32>
    %44 = arith.select %33, %38, %43 : vector<1x2x2xi1>, vector<1x2x2xf32>
    %c0_i32_5 = arith.constant 0 : i32
    %45 = vector.broadcast %c0_i32_5 : i32 to vector<1x2x2xi32>
    %46 = arith.cmpi eq, %30, %45 : vector<1x2x2xi32>
    %c0_i32_6 = arith.constant 0 : i32
    %47 = vector.broadcast %c0_i32_6 : i32 to vector<1x2x2xi32>
    %48 = arith.cmpi eq, %31, %47 : vector<1x2x2xi32>
    %49 = vector.broadcast %0 : f32 to vector<1x2x2xf32>
    %50 = vector.broadcast %1 : f32 to vector<1x2x2xf32>
    %51 = arith.select %48, %49, %50 : vector<1x2x2xi1>, vector<1x2x2xf32>
    %c0_i32_7 = arith.constant 0 : i32
    %52 = vector.broadcast %c0_i32_7 : i32 to vector<1x2x2xi32>
    %53 = arith.cmpi eq, %31, %52 : vector<1x2x2xi32>
    %54 = vector.broadcast %2 : f32 to vector<1x2x2xf32>
    %55 = vector.broadcast %3 : f32 to vector<1x2x2xf32>
    %56 = arith.select %53, %54, %55 : vector<1x2x2xi1>, vector<1x2x2xf32>
    %57 = arith.select %46, %51, %56 : vector<1x2x2xi1>, vector<1x2x2xf32>
    %cst_8 = arith.constant 0.000000e+00 : f32
    %58 = vector.broadcast %cst_8 : f32 to vector<1x2x2xf32>
    %59 = arith.subf %58, %44 : vector<1x2x2xf32>
    %60 = math.exp %59 : vector<1x2x2xf32>
    %cst_9 = arith.constant 1.000000e+00 : f32
    %61 = vector.broadcast %cst_9 : f32 to vector<1x2x2xf32>
    %62 = arith.addf %61, %60 : vector<1x2x2xf32>
    %cst_10 = arith.constant 1.000000e+00 : f32
    %63 = vector.broadcast %cst_10 : f32 to vector<1x2x2xf32>
    %64 = arith.divf %63, %62 : vector<1x2x2xf32>
    %65 = arith.addf %64, %57 : vector<1x2x2xf32>
    %c0_11 = arith.constant 0 : index
    %c0_12 = arith.constant 0 : index
    %c0_13 = arith.constant 0 : index
    %66 = vector.load %arg1[%c0_11, %c0_12, %c0_13] : memref<1x2x2xf32, #tpu.memory_space<vmem>>, vector<1x2x2xf32>
    tpu.vector_store %arg1[%c0_11, %c0_12, %c0_13], %65 {strides = array<i32>} : memref<1x2x2xf32, #tpu.memory_space<vmem>>, vector<1x2x2xf32>,
    return
  }
}

</mosaic_0001>

<bundles_post_ra>
// kernel: tpu_custom_call.1
= control target key start
LH: loop header
LB: loop body
LE: loop exit
PB: predicated region body
PF: predicated region fallthrough
CT: control target
= control target key end

     0   :  { %6 = vsyncpa [#allocation4], 0  ;;  %s213_s0 = inlined_call_operand.hbm [shape: f32[10], index: 0, kind: input, shape index: {}]   ;;  %s214_s1 = inlined_call_operand.hbm [shape: f32[1,2,2], index: 1, kind: output, shape index: {}]  }
   0x1   :  { %7 = vsyncpa [#allocation3], 0  ;;  %s110_s8 = scalar_lea.hbm %s213_s0, 16 }
   0x2   :  { %p111_p0 = scmp.ne.s32.totalorder %s213_s0, %s110_s8  ;;  %p114_p1 = scmp.lt.u32.totalorder %s110_s8, %s213_s0 }
   0x4   :  { %p116_p2 = pnand %p114_p1, %p111_p0 }
   0x6   :  { %119 = shalt.err (!%p116_p2)
}
   0x7   :  { %s146_s13 = smov [#allocation2]  }
   0x8   :  { %15 = dma.hbm_to_smem %s213_s0, 16, %s146_s13, [#allocation4]  }
   0x9   :  { %142 = dma.done.wait [#allocation4], 16  }
   0xa   :  { %143 = vsyncadd [#allocation4], 4294967280 }
   0xb   :  { %19 = sfence }
   0xc   :  { %s171_s16 = sld [smem:[#allocation2]]  ;;  %s173_s17 = sld [smem:[#allocation2 + $0x2]]  ;;  %v50_v0 = vlaneseq  ;;  %vm77_vm2 = vcmask 9216  }
   0xd   :  { %s97_s18 = sld [smem:[#allocation2 + $0x4]]  ;;  %s98_s19 = sld [smem:[#allocation2 + $0x5]] }
   0xe   :  { %s99_s20 = sld [smem:[#allocation2 + $0x6]]  ;;  %s100_s21 = sld [smem:[#allocation2 + $0x7]]  ;;  %v53_v1 = vand.u32 127, %v50_v0  ;;  %v51_v2 = vshrl.u32 %v50_v0, 7 }
   0xf   :  { %s175_s22 = sld [smem:[#allocation2 + $0x1]]  ;;  %s177_s0 = sld [smem:[#allocation2 + $0x3]] }
  0x10   :  { %s101_s23 = sld [smem:[#allocation2 + $0x8]]  ;;  %s179_s24 = sld [smem:[#allocation2 + $0x9]]  ;;  %vm55_vm0 = vcmp.eq.s32.totalorder %v53_v1, 0  ;;  %vm54_vm1 = vcmp.eq.s32.totalorder %v51_v2, 0 }
  0x11   :  { %s147_s6 = smov 0.0  }
  0x12   :  { %v63_v14 = vstv %s171_s16  ;;  %v66_v16 = vstv %s173_s17 }
  0x13   :  { %s30_s25 = smul.f32 %s97_s18, %s171_s16 }
  0x14   :  { %s31_s26 = smul.f32 %s98_s19, %s173_s17 }
  0x15   :  { %s35_s27 = smul.f32 %s99_s20, %s171_s16  ;;  %v64_v15 = vstv %s175_s22  ;;  %v67_v17 = vstv %s177_s0 }
  0x16   :  { %s32_s28 = sadd.f32 %s31_s26, %s30_s25  ;;  %s36_s29 = smul.f32 %s100_s21, %s173_s17  ;;  %v65_v18 = vsel %vm55_vm0, %v63_v14, %v64_v15  ;;  %v68_v19 = vsel %vm55_vm0, %v66_v16, %v67_v17 }
  0x17   :  { %s40_s30 = smul.f32 %s97_s18, %s175_s22  ;;  %v69_v20 = vsel %vm54_vm1, %v65_v18, %v68_v19 }
  0x18   :  { %s33_s2 = sadd.f32 %s101_s23, %s32_s28  ;;  %s41_s3 = smul.f32 %s98_s19, %s177_s0 }
  0x19   :  { %s37_s4 = sadd.f32 %s36_s29, %s35_s27  ;;  %s45_s5 = smul.f32 %s99_s20, %s175_s22 }
  0x1a   :  { %s34_s7 = smax.f32 %s147_s6, %s33_s2  ;;  %s42_s8 = sadd.f32 %s41_s3, %s40_s30 }
  0x1b   :  { %s38_s9 = sadd.f32 %s179_s24, %s37_s4  ;;  %s46_s10 = smul.f32 %s100_s21, %s177_s0  ;;  %v56_v3 = vstv %s34_s7 }
  0x1c   :  { %s43_s11 = sadd.f32 %s101_s23, %s42_s8  ;;  %s148_s19 = smov [#allocation5]  }
  0x1d   :  { %s39_s12 = smax.f32 %s147_s6, %s38_s9  ;;  %s47_s13 = sadd.f32 %s46_s10, %s45_s5 }
  0x1e   :  { %s44_s14 = smax.f32 %s147_s6, %s43_s11  ;;  %v57_v4 = vstv %s39_s12  ;;  %s85_s20 = sshll.u32 %s148_s19, 4  ;;  %s86_s20 = int_to_ptr.vmem [resolvable:$true] %s85_s20 }
  0x1f   :  { %s48_s15 = sadd.f32 %s179_s24, %s47_s13  ;;  %v59_v5 = vstv %s44_s14  ;;  %v58_v6 = vsel %vm55_vm0, %v56_v3, %v57_v4  ;;  %s120_s21 = scalar_lea.vmem %s86_s20, 32 }
  0x20   :  { %p121_p3 = scmp.ne.s32.totalorder %s86_s20, %s120_s21  ;;  %p125_p4 = scmp.lt.s32.totalorder %s86_s20, %s86_s20 }
  0x21   :  { %s49_s18 = smax.f32 %s147_s6, %s48_s15  ;;  %p126_p5 = scmp.lt.s32.totalorder %s120_s21, %s120_s21 }
  0x22   :  { %v60_v7 = vstv %s49_s18 }
  0x23   :  { %v61_v8 = vsel %vm55_vm0, %v59_v5, %v60_v7  ;;  %p127_p6 = por %p126_p5, %p125_p4 }
  0x24   :  { %v62_v9 = vsel %vm54_vm1, %v58_v6, %v61_v8 }
  0x25   :  { %v70_v10 = vsub.f32 0.0, %v62_v9  ;;  %p128_p7 = pnand %p127_p6, %p121_p3 }
  0x27   :  { %v71_v11 = vmul.f32 1.442695, %v70_v10 }
  0x29   :  { %106 = vpow2.f32 %v71_v11 }
  0x33   :  { %v107_v12 = vpop.eup %106 }
  0x34   :  { %v73_v13 = vadd.f32 1.0, %v107_v12 }
  0x36   :  { %108 = vrcp.f32 %v73_v13 }
  0x40   :  { %v109_v21 = vpop.eup %108 }
  0x41   :  { %v76_v22 = vadd.f32 %v109_v21, %v69_v20 }
  0x43   :  { %78 = vst.msk [vmem:[#allocation5] sm:$0x3] %vm77_vm2, %v76_v22 }
  0x44   :  { %131 = shalt.err (!%p128_p7)
}
  0x45   :  { %s132_s22 = scalar_lea.hbm %s214_s1, 32 }
  0x46   :  { %p133_p8 = scmp.ne.s32.totalorder %s214_s1, %s132_s22  ;;  %p136_p9 = scmp.lt.u32.totalorder %s132_s22, %s214_s1 }
  0x48   :  { %p138_p10 = pnand %p136_p9, %p133_p8 }
  0x4a   :  { %141 = shalt.err (!%p138_p10)
}
  0x4b   :  { %88 = dma.vmem_to_hbm [thread:$0]  %s86_s20, 32, %s214_s1, [#allocation3]  }
  0x4c   :  { %144 = dma.done.wait [#allocation3], 32  }
  0x4d   :  { %145 = vsyncadd [#allocation3], 4294967264 }
  0x4e   :  { %92 = vsyncpa [#allocation3], 1 }
  0x4f   :  { %93 = vsyncpa [#allocation4], 1 }

</bundles_post_ra>
